<compile_context>
chip_gen: v7x
topology: tpu7x:2x2x1
jax: 0.10.0
libtpu: 0.0.40
codegen_flags: <defaults>
</compile_context>

<pallas_src>
import jax
import jax.numpy as jnp
from jax.experimental import pallas as pl
from jax.experimental.pallas import tpu as pltpu


def _proto_matmul_kernel(x_ref, w_ref, o_ref):
    # x_ref: (tile_b, D), w_ref: (D, tile_k) pre-transposed at init.
    # Single MXU matmul per grid cell, f32 accumulation.
    o_ref[...] = jnp.dot(
        x_ref[...], w_ref[...], preferred_element_type=jnp.float32
    ).astype(o_ref.dtype)


def _pick_tile(total, preferred, quantum):
    """Largest tile <= preferred that evenly divides `total` (requires total % quantum == 0)."""
    if total <= preferred:
        return total
    t = (preferred // quantum) * quantum
    while total % t:
        t -= quantum
    return t


def fused_prototypes_matmul(x, w_t, *, out_dtype=None):
    """x: (B, D), w_t: (D, K_pad) pre-transposed, lane-padded weights -> (B, K_pad)."""
    B, D = x.shape
    D2, Kp = w_t.shape
    assert D == D2 and Kp % 128 == 0
    out_dtype = out_dtype or x.dtype

    # Pad batch to the sublane quantum so tiled block shapes stay (8,128)-aligned.
    Bp = ((B + 7) // 8) * 8
    if Bp != B:
        x = jnp.pad(x, ((0, Bp - B), (0, 0)))

    # Tiles: big enough to keep the MXU fed, small enough (each block <~1 MiB,
    # times 2 double-buffers per operand) to stay far below scoped VMEM on all
    # of v5e / v6e / v7x.
    tile_b = _pick_tile(Bp, 256, 8)
    tile_k = _pick_tile(Kp, 512, 128)
    grid = (Bp // tile_b, Kp // tile_k)

    out = pl.pallas_call(
        _proto_matmul_kernel,
        out_shape=jax.ShapeDtypeStruct((Bp, Kp), out_dtype),
        grid=grid,
        in_specs=[
            pl.BlockSpec((tile_b, D), lambda i, j: (i, 0)),
            pl.BlockSpec((D, tile_k), lambda i, j: (0, j)),
        ],
        out_specs=pl.BlockSpec((tile_b, tile_k), lambda i, j: (i, j)),
        compiler_params=pltpu.CompilerParams(
            dimension_semantics=("parallel", "parallel"),
            vmem_limit_bytes=32 * 1024 * 1024,
        ),
        cost_estimate=pl.CostEstimate(
            flops=2 * Bp * D * Kp,
            transcendentals=0,
            bytes_accessed=(Bp * D + D * Kp) * x.dtype.itemsize
            + Bp * Kp * jnp.dtype(out_dtype).itemsize,
        ),
    )(x, w_t)

    if Bp != B:
        out = out[:B]
    return out


class MultiPrototypes:
    """JAX/Pallas port of SwAV's MultiPrototypes (list of bias-free Linear heads),
    fused into one lane-dense Pallas matmul launch per forward."""

    def __init__(self, output_dim, nmb_prototypes, key, param_dtype=jnp.float32):
        self.nmb_heads = len(nmb_prototypes)
        self.nmb_prototypes = list(nmb_prototypes)
        self.output_dim = output_dim
        self.param_dtype = param_dtype

        bound = 1.0 / (output_dim ** 0.5)  # nn.Linear default init bound
        self.weights = []
        for k in nmb_prototypes:
            key, sub = jax.random.split(key)
            w = jax.random.uniform(
                sub, (k, output_dim), dtype=jnp.float32,
                minval=-bound, maxval=bound,
            )
            self.weights.append(w)

        # Fuse heads: concat along K, lane-pad K_total to a multiple of 128,
        # pre-transpose to (D, K_pad) so the kernel never transposes W.
        k_total = sum(self.nmb_prototypes)
        k_pad = ((k_total + 127) // 128) * 128
        w_cat = jnp.concatenate(self.weights, axis=0)            # (K_total, D)
        w_cat = jnp.pad(w_cat, ((0, k_pad - k_total), (0, 0)))   # (K_pad, D)
        self.w_t = jnp.asarray(w_cat.T, dtype=param_dtype)       # (D, K_pad)

        # Per-head slice boundaries into the fused output (padding excluded).
        offs = [0]
        for k in self.nmb_prototypes:
            offs.append(offs[-1] + k)
        nmb_heads = self.nmb_heads
        w_t = self.w_t

        # One jitted forward: a single pallas_call dispatch; the per-head split
        # is a static slice that never touches the padding lanes.
        @jax.jit
        def _forward(x):
            xc = x.astype(param_dtype) if x.dtype != param_dtype else x
            fused = fused_prototypes_matmul(xc, w_t, out_dtype=jnp.float32)
            return [fused[:, offs[i]:offs[i + 1]] for i in range(nmb_heads)]

        self._forward = _forward

    def __call__(self, x):
        return self._forward(x)


if __name__ == "__main__":
    key = jax.random.PRNGKey(0)
    k_x, k_params = jax.random.split(key)

    batch = 8
    output_dim = 32
    nmb_prototypes = [16, 24, 8]

    x = jax.random.normal(k_x, (batch, output_dim), dtype=jnp.float32)

    # f32 parameters: exact match to nn.Linear(bias=False) semantics.
    model = MultiPrototypes(output_dim, nmb_prototypes, k_params)
    outs = [jax.block_until_ready(o) for o in model(x)]
    for o, w in zip(outs, model.weights):
        ref = x @ w.T
        assert o.shape == ref.shape
        assert jnp.allclose(o, ref, atol=1e-5, rtol=1e-5)

    # Padded-batch path (B not a multiple of 8) must also be exact.
    x_odd = x[:6]
    outs_odd = [jax.block_until_ready(o) for o in model(x_odd)]
    for o, w in zip(outs_odd, model.weights):
        assert jnp.allclose(o, x_odd @ w.T, atol=1e-5, rtol=1e-5)

    # bf16 weight path (HBM-traffic-friendly variant); f32 accumulation, looser tol.
    model_bf16 = MultiPrototypes(output_dim, nmb_prototypes, k_params,
                                 param_dtype=jnp.bfloat16)
    outs_bf16 = [jax.block_until_ready(o) for o in model_bf16(x)]
    for o, w in zip(outs_bf16, model_bf16.weights):
        ref = x @ w.T
        assert o.shape == ref.shape
        assert jnp.allclose(o, ref, atol=5e-2, rtol=5e-2)

    print("KERNEL_OK")
</pallas_src>

<mosaic_0001>
module attributes {stable_mosaic.version = 11 : i64} {
  func.func @_proto_matmul_kernel(%arg0: i32, %arg1: i32, %arg2: memref<8x32xf32, #tpu.memory_space<vmem>>, %arg3: memref<32x128xf32, #tpu.memory_space<vmem>>, %arg4: memref<8x128xf32, #tpu.memory_space<vmem>>) attributes {dimension_semantics = [#tpu.dimension_semantics<parallel>, #tpu.dimension_semantics<parallel>], iteration_bounds = array<i64: 1, 1>, scalar_prefetch = 0 : i64, scratch_operands = 0 : i64, tpu.core_type = #tpu.core_type<tc>, window_params = [{transform_indices = @transform_0, window_bounds = array<i64: 8, 32>}, {transform_indices = @transform_1, window_bounds = array<i64: 32, 128>}, {transform_indices = @transform_2, window_bounds = array<i64: 8, 128>}]} {
    %c0 = arith.constant 0 : index
    %c0_0 = arith.constant 0 : index
    %0 = vector.load %arg2[%c0, %c0_0] : memref<8x32xf32, #tpu.memory_space<vmem>>, vector<8x32xf32>
    %c0_1 = arith.constant 0 : index
    %c0_2 = arith.constant 0 : index
    %1 = vector.load %arg3[%c0_1, %c0_2] : memref<32x128xf32, #tpu.memory_space<vmem>>, vector<32x128xf32>
    %cst = arith.constant dense<0.000000e+00> : vector<8x128xf32>
    %2 = tpu.matmul %0, %1, %cst {dimension_numbers = #tpu.dot_dimension_numbers<[1], [0], [0], [1], [0, 0, 1, 1], [], []>} : vector<8x32xf32>, vector<32x128xf32>, vector<8x128xf32> -> vector<8x128xf32>
    %c0_3 = arith.constant 0 : index
    %c0_4 = arith.constant 0 : index
    %3 = vector.load %arg4[%c0_3, %c0_4] : memref<8x128xf32, #tpu.memory_space<vmem>>, vector<8x128xf32>
    tpu.vector_store %arg4[%c0_3, %c0_4], %2 {strides = array<i32>} : memref<8x128xf32, #tpu.memory_space<vmem>>, vector<8x128xf32>,
    return
  }
  func.func @transform_0(%arg0: i32, %arg1: i32) -> (i32, i32) {
    %c0_i32 = arith.constant 0 : i32
    %c0_i32_0 = arith.constant 0 : i32
    return %arg0, %c0_i32 : i32, i32
  }
  func.func @transform_1(%arg0: i32, %arg1: i32) -> (i32, i32) {
    %c0_i32 = arith.constant 0 : i32
    %c0_i32_0 = arith.constant 0 : i32
    return %c0_i32, %arg1 : i32, i32
  }
  func.func @transform_2(%arg0: i32, %arg1: i32) -> (i32, i32) {
    %c0_i32 = arith.constant 0 : i32
    return %arg0, %arg1 : i32, i32
  }
}

</mosaic_0001>

<bundles_post_ra>
// kernel: _forward.1
= control target key start
LH: loop header
LB: loop body
LE: loop exit
PB: predicated region body
PF: predicated region fallthrough
CT: control target
= control target key end

     0   :  { %7 = vsyncpa [#allocation3], 0  ;;  %s257_s0 = inlined_call_operand.hbm [shape: f32[8,32], index: 0, kind: input, shape index: {}]   ;;  %s258_s1 = inlined_call_operand.hbm [shape: f32[32,128], index: 1, kind: input, shape index: {}]   ;;  %s259_s2 = inlined_call_operand.vmem [shape: f32[8,128], index: 2, kind: output, shape index: {}]  }
   0x1   :  { %8 = vsyncpa [#allocation5], 0  ;;  %s201_s9 = smov [#allocation2]   ;;  %s202_s11 = smov [#allocation4]  }
   0x2   :  { %s15_s10 = sshll.u32 %s201_s9, 4  ;;  %s24_s12 = sshll.u32 %s202_s11, 4  ;;  %s16_s10 = int_to_ptr.vmem [resolvable:$true] %s15_s10  ;;  %s223_s12 = int_to_ptr.vmem [resolvable:$true] %s24_s12 }
   0x3   :  { %s153_s15 = scalar_lea.hbm %s257_s0, 128 }
   0x4   :  { %p154_p0 = scmp.ne.s32.totalorder %s257_s0, %s153_s15  ;;  %p157_p1 = scmp.lt.u32.totalorder %s153_s15, %s257_s0 }
   0x6   :  { %p159_p2 = pnand %p157_p1, %p154_p0 }
   0x8   :  { %162 = shalt.err (!%p159_p2)
}
   0x9   :  { %s163_s20 = scalar_lea.vmem %s16_s10, 128  ;;  %p168_p4 = scmp.lt.s32.totalorder %s16_s10, %s16_s10 }
   0xa   :  { %p164_p3 = scmp.ne.s32.totalorder %s16_s10, %s163_s20  ;;  %p169_p5 = scmp.lt.s32.totalorder %s163_s20, %s163_s20 }
   0xc   :  { %p170_p6 = por %p169_p5, %p168_p4 }
   0xe   :  { %p171_p7 = pnand %p170_p6, %p164_p3 }
  0x10   :  { %174 = shalt.err (!%p171_p7)
}
  0x11   :  { %18 = dma.hbm_to_vmem [thread:$0]  %s257_s0, 128, %s16_s10, [#allocation3]  }
  0x12   :  { %s175_s25 = scalar_lea.hbm %s258_s1, 512 }
  0x13   :  { %p176_p8 = scmp.ne.s32.totalorder %s258_s1, %s175_s25  ;;  %p179_p9 = scmp.lt.u32.totalorder %s175_s25, %s258_s1 }
  0x15   :  { %p181_p10 = pnand %p179_p9, %p176_p8 }
  0x17   :  { %184 = shalt.err (!%p181_p10)
}
  0x18   :  { %s185_s30 = scalar_lea.vmem %s223_s12, 512  ;;  %p190_p12 = scmp.lt.s32.totalorder %s223_s12, %s223_s12 }
  0x19   :  { %p186_p11 = scmp.ne.s32.totalorder %s223_s12, %s185_s30  ;;  %p191_p13 = scmp.lt.s32.totalorder %s185_s30, %s185_s30 }
  0x1b   :  { %p192_p0 = por %p191_p13, %p190_p12 }
  0x1d   :  { %p193_p1 = pnand %p192_p0, %p186_p11 }
  0x1f   :  { %196 = shalt.err (!%p193_p1)
}
  0x20   :  { %s203_s0 = smov 128   ;;  %s204_s3 = smov 8  }
  0x21   :  { %30 = dma.hbm_to_vmem [thread:$0]  %s258_s1, 512, %s223_s12, [#allocation5], %s203_s0, %s203_s0, %s204_s3  }
  0x22   :  { %197 = dma.done.wait [#allocation3], 128  }
  0x23   :  { %198 = vsyncadd [#allocation3], 4294967168 }
  0x24   :  { %199 = dma.done.wait [#allocation5], 512  }
  0x25   :  { %200 = vsyncadd [#allocation5], 4294966784  ;;  %v205_v0 = vmov 0.0|0.0   ;;  %vm206_vm0 = vmmov 0   ;;  %v207_v1 = vmov 0.0   ;;  %v38_v2 = vld [vmem:[#allocation4] sm:$0xff] }
  0x26   :  { %140 = vmatprep.subr.bf16.mxu0 %v205_v0  ;;  %137 = vmatprep.mubr.msk.f32.mxu0 %vm206_vm0, %v207_v1  ;;  %v39_v3 = vld [vmem:[#allocation4 + $0x8] sm:$0xff]  ;;  %v40_v4 = vld [vmem:[#allocation4 + $0x10] sm:$0xff]  ;;  %v41_v6 = vld [vmem:[#allocation4 + $0x18] sm:$0xff]  ;;  %vm42_vm1 = vcmask 261120  }
  0x27   :  { %v141_v5 = vpack.c.bf16 %v39_v3, %v38_v2  ;;  %v144_v7 = vpack.c.bf16 %v41_v6, %v40_v4  ;;  %v37_v8 = vld [vmem:[#allocation2] sm:$0xff] }
  0x29   :  { %142 = vmatpush3.bf16.msra.mxu0 %v141_v5 }
  0x2a   :  { %143 = vmatprep.subr.bf16.mxu0 %v205_v0 }
  0x2d   :  { %145 = vmatpush3.bf16.msra.mxu0 %v144_v7 }
  0x30   :  { %138 = vmatmul.mubr.msk.f32.vlgmr.msra.gmra.mrb[0].mxu0 %vm42_vm1, %v37_v8 }
 0x103   :  { %v112_v9 = vpop.f32.mrb[0].mxu0 }
 0x104   :  { %116 = vst [vmem:[%s259_s2] sm:$0xff] %v112_v9  ;;  %v139_v10 = vpop.f32.mrb[1].mxu0 }
 0x105   :  { %121 = vsyncpa [#allocation3], 1 }
 0x106   :  { %122 = vsyncpa [#allocation5], 1 }

</bundles_post_ra>
